<compile_context>
chip_gen: v7x
topology: tpu7x:2x2x1
jax: 0.10.0
libtpu: 0.0.40
codegen_flags: <defaults>
</compile_context>

<pallas_src>
import math

import jax
import jax.numpy as jnp
from jax.experimental import pallas as pl
from jax.experimental.pallas import tpu as pltpu


HP = 128  # padded hidden width (one full lane tile)


def mlp_policy_kernel(x_ref, wa_ref, ba_ref, w2_ref, w3_ref, out_ref):
    # x_ref: [TB, D] bf16; wa: [D, 128] bf16; ba: [1, 128] f32; w2/w3: [128, 128] bf16
    x = x_ref[...]

    # Layer 1 fused with temp head: lanes [0:H)=pre-ReLU hidden, lane H = t = x@wt+bt,
    # lane H+1 = -t, lane 127 = 1.0 (ones lane).  bf16 MXU, f32 accumulate + f32 bias.
    ya = jnp.dot(x, wa_ref[...], preferred_element_type=jnp.float32) + ba_ref[...]
    h = jnp.maximum(ya, 0.0)                                    # [TB, 128] f32

    # Layer 2 + ReLU. Bias folded in row 127 (ones lane); lanes H/H+1/127 pass through.
    h2 = jnp.maximum(
        jnp.dot(h.astype(jnp.bfloat16), w2_ref[...],
                preferred_element_type=jnp.float32), 0.0)

    # Layer 3. Actions land in lanes [0:A); lane A = relu(t) - relu(-t) = t (temp head);
    # bias folded in row 127. One unmasked lane-dense store.
    out_ref[...] = jnp.dot(h2.astype(jnp.bfloat16), w3_ref[...],
                           preferred_element_type=jnp.float32)


def pack_params(p, hp=HP):
    """One-time packing of [in, out]-layout weights into lane-dense, bias-folded tiles.
    Matmul operands are cast to bf16; the layer-1/temp bias vector stays f32."""
    D, H = p["w1"].shape
    A = p["w3"].shape[1]
    assert H + 2 < hp and A + 1 <= H and hp % 128 == 0

    t_pos, t_neg, ones = H, H + 1, hp - 1

    # Fused first layer + temp head: [D, hp]
    wa = jnp.zeros((D, hp), jnp.float32)
    wa = wa.at[:, :H].set(p["w1"])
    wa = wa.at[:, t_pos:t_pos + 1].set(p["wt"])
    wa = wa.at[:, t_neg:t_neg + 1].set(-p["wt"])

    ba = jnp.zeros((1, hp), jnp.float32)
    ba = ba.at[:, :H].set(p["b1"])
    ba = ba.at[0, t_pos].set(p["bt"][0, 0])
    ba = ba.at[0, t_neg].set(-p["bt"][0, 0])
    ba = ba.at[0, ones].set(1.0)                 # ones-lane seed for folded biases

    # controller[2]: bias in row `ones`; identity passthrough for temp & ones lanes
    w2 = jnp.zeros((hp, hp), jnp.float32)
    w2 = w2.at[:H, :H].set(p["w2"])
    w2 = w2.at[ones, :H].set(p["b2"][0])
    w2 = w2.at[t_pos, t_pos].set(1.0)
    w2 = w2.at[t_neg, t_neg].set(1.0)
    w2 = w2.at[ones, ones].set(1.0)

    # controller[4]: actions in cols [0:A); bias in row `ones`;
    # temp reconstructed into col A via +-1 on the relu(t)/relu(-t) lanes.
    w3 = jnp.zeros((hp, hp), jnp.float32)
    w3 = w3.at[:H, :A].set(p["w3"])
    w3 = w3.at[ones, :A].set(p["b3"][0])
    w3 = w3.at[t_pos, A].set(1.0)
    w3 = w3.at[t_neg, A].set(-1.0)

    return dict(
        wa=wa.astype(jnp.bfloat16),
        ba=ba,                                   # f32 (VPU epilogue add)
        w2=w2.astype(jnp.bfloat16),
        w3=w3.astype(jnp.bfloat16),
        hp=hp,
        n_actions=A,
    )


def _round_up(x, m):
    return ((x + m - 1) // m) * m


def mlp_policy_forward(src, packed, *, batch_tile=256):
    B, D = src.shape
    hp = packed["hp"]
    A = packed["n_actions"]

    # Batch tile: multiple of 8 sublanes, capped by requested tile; pad batch to a
    # multiple of it so every grid step is a full, unmasked block.
    tb = min(batch_tile, _round_up(B, 8))
    bp = _round_up(B, tb)

    x = src.astype(jnp.bfloat16)                 # halve src DMA bytes
    if bp != B:
        x = jnp.pad(x, ((0, bp - B), (0, 0)))

    grid = (bp // tb,)
    flops = 2 * bp * (D * hp + 2 * hp * hp)
    bytes_accessed = 2 * (bp * D + D * hp + 2 * hp * hp) + 4 * (hp + bp * hp)

    out = pl.pallas_call(
        mlp_policy_kernel,
        out_shape=jax.ShapeDtypeStruct((bp, hp), jnp.float32),
        grid_spec=pltpu.PrefetchScalarGridSpec(
            num_scalar_prefetch=0,
            grid=grid,
            in_specs=[
                pl.BlockSpec((tb, D), lambda i: (i, 0)),    # src tile (pipelined)
                pl.BlockSpec((D, hp), lambda i: (0, 0)),    # wa  (VMEM-resident)
                pl.BlockSpec((1, hp), lambda i: (0, 0)),    # ba  (VMEM-resident)
                pl.BlockSpec((hp, hp), lambda i: (0, 0)),   # w2  (VMEM-resident)
                pl.BlockSpec((hp, hp), lambda i: (0, 0)),   # w3  (VMEM-resident)
            ],
            out_specs=pl.BlockSpec((tb, hp), lambda i: (i, 0)),
        ),
        compiler_params=pltpu.CompilerParams(
            dimension_semantics=("parallel",)),              # v7x: 2 TCs share batch
        cost_estimate=pl.CostEstimate(
            flops=flops, transcendentals=0, bytes_accessed=bytes_accessed),
    )(x, packed["wa"], packed["ba"], packed["w2"], packed["w3"])

    actions = out[:B, :A]
    temp_distance = out[:B, A:A + 1]
    return actions, temp_distance


def init_linear(key, fan_in, fan_out):
    """Deterministic init mimicking torch.nn.Linear default (uniform +- 1/sqrt(fan_in))."""
    kw, kb = jax.random.split(key)
    bound = 1.0 / math.sqrt(fan_in)
    w = jax.random.uniform(kw, (fan_in, fan_out), jnp.float32, -bound, bound)
    b = jax.random.uniform(kb, (1, fan_out), jnp.float32, -bound, bound)
    return w, b


def reference_forward(src, p):
    h = jnp.maximum(src @ p["w1"] + p["b1"], 0.0)
    h = jnp.maximum(h @ p["w2"] + p["b2"], 0.0)
    actions = h @ p["w3"] + p["b3"]
    temp = src @ p["wt"] + p["bt"]
    return actions, temp


if __name__ == "__main__":
    # Shapes consistent with the module (controller assumed to be the standard
    # Linear-ReLU-Linear-ReLU-Linear stack used with MLPPolicy):
    obs_context_size = 32
    obs_len = 7
    D = obs_context_size * (obs_len + 1)   # 256 = controller[0].in_features
    H = 64                                  # controller hidden width
    A = 2                                   # action dim
    B = 8                                   # small batch

    key = jax.random.PRNGKey(0)
    k_src, k_src2, k1, k2, k3, kt = jax.random.split(key, 6)

    w1, b1 = init_linear(k1, D, H)
    w2, b2 = init_linear(k2, H, H)
    w3, b3 = init_linear(k3, H, A)
    wt, bt = init_linear(kt, D, 1)
    params = dict(w1=w1, b1=b1, w2=w2, b2=b2, w3=w3, b3=b3, wt=wt, bt=bt)

    packed = pack_params(params)            # one-time weight packing (bf16 operands)
    packed = jax.tree_util.tree_map(
        lambda x: jax.block_until_ready(x) if isinstance(x, jax.Array) else x, packed)

    # --- small batch: single grid step ---
    src = jax.random.normal(k_src, (B, D), jnp.float32)
    actions, temp_distance = mlp_policy_forward(src, packed)
    jax.block_until_ready(actions)
    jax.block_until_ready(temp_distance)

    ref_actions, ref_temp = reference_forward(src, params)
    assert actions.shape == (B, A) and temp_distance.shape == (B, 1)
    assert jnp.allclose(actions, ref_actions, atol=2e-2, rtol=2e-2)
    assert jnp.allclose(temp_distance, ref_temp, atol=2e-2, rtol=2e-2)

    # --- larger, non-tile-multiple batch: exercises the batch grid + padding path ---
    B2 = 384
    src2 = jax.random.normal(k_src2, (B2, D), jnp.float32)
    actions2, temp2 = mlp_policy_forward(src2, packed, batch_tile=256)
    jax.block_until_ready(actions2)
    jax.block_until_ready(temp2)

    ref_a2, ref_t2 = reference_forward(src2, params)
    assert actions2.shape == (B2, A) and temp2.shape == (B2, 1)
    assert jnp.allclose(actions2, ref_a2, atol=2e-2, rtol=2e-2)
    assert jnp.allclose(temp2, ref_t2, atol=2e-2, rtol=2e-2)

    print("KERNEL_OK")
</pallas_src>

<mosaic_0001>
module attributes {stable_mosaic.version = 11 : i64} {
  func.func @mlp_policy_kernel(%arg0: i32, %arg1: memref<8x256xbf16, #tpu.memory_space<vmem>>, %arg2: memref<256x128xbf16, #tpu.memory_space<vmem>>, %arg3: memref<1x128xf32, #tpu.memory_space<vmem>>, %arg4: memref<128x128xbf16, #tpu.memory_space<vmem>>, %arg5: memref<128x128xbf16, #tpu.memory_space<vmem>>, %arg6: memref<8x128xf32, #tpu.memory_space<vmem>>) attributes {dimension_semantics = [#tpu.dimension_semantics<parallel>], iteration_bounds = array<i64: 1>, scalar_prefetch = 0 : i64, scratch_operands = 0 : i64, tpu.core_type = #tpu.core_type<tc>, window_params = [{transform_indices = @transform_0, window_bounds = array<i64: 8, 256>}, {pipeline_mode = #tpu.pipeline_mode<synchronous>, transform_indices = @transform_1, window_bounds = array<i64: 256, 128>}, {pipeline_mode = #tpu.pipeline_mode<synchronous>, transform_indices = @transform_2, window_bounds = array<i64: 1, 128>}, {pipeline_mode = #tpu.pipeline_mode<synchronous>, transform_indices = @transform_3, window_bounds = array<i64: 128, 128>}, {pipeline_mode = #tpu.pipeline_mode<synchronous>, transform_indices = @transform_4, window_bounds = array<i64: 128, 128>}, {transform_indices = @transform_5, window_bounds = array<i64: 8, 128>}]} {
    %c0 = arith.constant 0 : index
    %c0_0 = arith.constant 0 : index
    %0 = vector.load %arg1[%c0, %c0_0] : memref<8x256xbf16, #tpu.memory_space<vmem>>, vector<8x256xbf16>
    %c0_1 = arith.constant 0 : index
    %c0_2 = arith.constant 0 : index
    %1 = vector.load %arg2[%c0_1, %c0_2] : memref<256x128xbf16, #tpu.memory_space<vmem>>, vector<256x128xbf16>
    %cst = arith.constant dense<0.000000e+00> : vector<8x128xf32>
    %2 = tpu.matmul %0, %1, %cst {dimension_numbers = #tpu.dot_dimension_numbers<[1], [0], [0], [1], [0, 0, 1, 1], [], []>} : vector<8x256xbf16>, vector<256x128xbf16>, vector<8x128xf32> -> vector<8x128xf32>
    %c0_3 = arith.constant 0 : index
    %c0_4 = arith.constant 0 : index
    %3 = vector.load %arg3[%c0_3, %c0_4] : memref<1x128xf32, #tpu.memory_space<vmem>>, vector<1x128xf32>
    %4 = vector.broadcast %3 : vector<1x128xf32> to vector<8x128xf32>
    %5 = arith.addf %2, %4 : vector<8x128xf32>
    %cst_5 = arith.constant 0.000000e+00 : f32
    %6 = vector.broadcast %cst_5 : f32 to vector<8x128xf32>
    %7 = arith.maximumf %5, %6 : vector<8x128xf32>
    %8 = arith.truncf %7 : vector<8x128xf32> to vector<8x128xbf16>
    %c0_6 = arith.constant 0 : index
    %c0_7 = arith.constant 0 : index
    %9 = vector.load %arg4[%c0_6, %c0_7] : memref<128x128xbf16, #tpu.memory_space<vmem>>, vector<128x128xbf16>
    %cst_8 = arith.constant dense<0.000000e+00> : vector<8x128xf32>
    %10 = tpu.matmul %8, %9, %cst_8 {dimension_numbers = #tpu.dot_dimension_numbers<[1], [0], [0], [1], [0, 0, 1, 1], [], []>} : vector<8x128xbf16>, vector<128x128xbf16>, vector<8x128xf32> -> vector<8x128xf32>
    %cst_9 = arith.constant 0.000000e+00 : f32
    %11 = vector.broadcast %cst_9 : f32 to vector<8x128xf32>
    %12 = arith.maximumf %10, %11 : vector<8x128xf32>
    %13 = arith.truncf %12 : vector<8x128xf32> to vector<8x128xbf16>
    %c0_10 = arith.constant 0 : index
    %c0_11 = arith.constant 0 : index
    %14 = vector.load %arg5[%c0_10, %c0_11] : memref<128x128xbf16, #tpu.memory_space<vmem>>, vector<128x128xbf16>
    %cst_12 = arith.constant dense<0.000000e+00> : vector<8x128xf32>
    %15 = tpu.matmul %13, %14, %cst_12 {dimension_numbers = #tpu.dot_dimension_numbers<[1], [0], [0], [1], [0, 0, 1, 1], [], []>} : vector<8x128xbf16>, vector<128x128xbf16>, vector<8x128xf32> -> vector<8x128xf32>
    %c0_13 = arith.constant 0 : index
    %c0_14 = arith.constant 0 : index
    %16 = vector.load %arg6[%c0_13, %c0_14] : memref<8x128xf32, #tpu.memory_space<vmem>>, vector<8x128xf32>
    tpu.vector_store %arg6[%c0_13, %c0_14], %15 {strides = array<i32>} : memref<8x128xf32, #tpu.memory_space<vmem>>, vector<8x128xf32>,
    return
  }
  func.func @transform_0(%arg0: i32) -> (i32, i32) {
    %c0_i32 = arith.constant 0 : i32
    %c0_i32_0 = arith.constant 0 : i32
    return %arg0, %c0_i32 : i32, i32
  }
  func.func @transform_1(%arg0: i32) -> (i32, i32) {
    %c0_i32 = arith.constant 0 : i32
    %c0_i32_0 = arith.constant 0 : i32
    %c0_i32_1 = arith.constant 0 : i32
    return %c0_i32, %c0_i32_0 : i32, i32
  }
  func.func @transform_2(%arg0: i32) -> (i32, i32) {
    %c0_i32 = arith.constant 0 : i32
    %c0_i32_0 = arith.constant 0 : i32
    %c0_i32_1 = arith.constant 0 : i32
    return %c0_i32, %c0_i32_0 : i32, i32
  }
  func.func @transform_3(%arg0: i32) -> (i32, i32) {
    %c0_i32 = arith.constant 0 : i32
    %c0_i32_0 = arith.constant 0 : i32
    %c0_i32_1 = arith.constant 0 : i32
    return %c0_i32, %c0_i32_0 : i32, i32
  }
  func.func @transform_4(%arg0: i32) -> (i32, i32) {
    %c0_i32 = arith.constant 0 : i32
    %c0_i32_0 = arith.constant 0 : i32
    %c0_i32_1 = arith.constant 0 : i32
    return %c0_i32, %c0_i32_0 : i32, i32
  }
  func.func @transform_5(%arg0: i32) -> (i32, i32) {
    %c0_i32 = arith.constant 0 : i32
    %c0_i32_0 = arith.constant 0 : i32
    return %arg0, %c0_i32 : i32, i32
  }
}

</mosaic_0001>

<bundles_post_ra>
// kernel: tpu_custom_call.1
= control target key start
LH: loop header
LB: loop body
LE: loop exit
PB: predicated region body
PF: predicated region fallthrough
CT: control target
= control target key end

     0   :  { %10 = vsyncpa [#allocation3], 0  ;;  %s893_s0 = inlined_call_operand.hbm [shape: bf16[8,256], index: 0, kind: input, shape index: {}]   ;;  %s894_s1 = inlined_call_operand.hbm [shape: bf16[256,128], index: 1, kind: input, shape index: {}]   ;;  %s895_s2 = inlined_call_operand.vmem [shape: f32[1,128], index: 2, kind: input, shape index: {}]   ;;  %s896_s3 = inlined_call_operand.hbm [shape: bf16[128,128], index: 3, kind: input, shape index: {}]   ;;  %s897_s4 = inlined_call_operand.hbm [shape: bf16[128,128], index: 4, kind: input, shape index: {}]   ;;  %s898_s5 = inlined_call_operand.hbm [shape: f32[8,128], index: 5, kind: output, shape index: {}]  }
   0x1   :  { %11 = vsyncpa [#allocation6], 0 }
   0x2   :  { %12 = vsyncpa [#allocation9], 0 }
   0x3   :  { %13 = vsyncpa [#allocation4], 0  ;;  %s764_s18 = smov [#allocation5]   ;;  %s646_s22 = scalar_lea.hbm %s894_s1, 2048 }
   0x4   :  { %s29_s19 = sshll.u32 %s764_s18, 4  ;;  %p647_p0 = scmp.ne.s32.totalorder %s894_s1, %s646_s22  ;;  %s30_s19 = int_to_ptr.vmem [resolvable:$true] %s29_s19 }
   0x5   :  { %p650_p1 = scmp.lt.u32.totalorder %s646_s22, %s894_s1 }
   0x7   :  { %p652_p2 = pnand %p650_p1, %p647_p0 }
   0x9   :  { %655 = shalt.err (!%p652_p2)
}
   0xa   :  { %s656_s27 = scalar_lea.vmem %s30_s19, 2048  ;;  %p661_p4 = scmp.lt.s32.totalorder %s30_s19, %s30_s19 }
   0xb   :  { %p657_p3 = scmp.ne.s32.totalorder %s30_s19, %s656_s27  ;;  %p662_p5 = scmp.lt.s32.totalorder %s656_s27, %s656_s27 }
   0xd   :  { %p663_p6 = por %p662_p5, %p661_p4 }
   0xf   :  { %p664_p7 = pnand %p663_p6, %p657_p3 }
  0x11   :  { %667 = shalt.err (!%p664_p7)
}
  0x12   :  { %s765_s28 = smov 64   ;;  %s766_s29 = smov 4  }
  0x13   :  { %35 = dma.hbm_to_vmem [thread:$0]  %s894_s1, 2048, %s30_s19, [#allocation6], %s765_s28, %s765_s28, %s766_s29  }
  0x14   :  { %s767_s7 = smov [#allocation2]   ;;  %s768_s9 = smov [#allocation7]  }
  0x15   :  { %s20_s8 = sshll.u32 %s767_s7, 4  ;;  %s43_s10 = sshll.u32 %s768_s9, 4  ;;  %s21_s8 = int_to_ptr.vmem [resolvable:$true] %s20_s8  ;;  %s44_s10 = int_to_ptr.vmem [resolvable:$true] %s43_s10 }
  0x16   :  { %s668_s13 = scalar_lea.hbm %s893_s0, 128 }
  0x17   :  { %p669_p8 = scmp.ne.s32.totalorder %s893_s0, %s668_s13  ;;  %p672_p9 = scmp.lt.u32.totalorder %s668_s13, %s893_s0 }
  0x19   :  { %p674_p10 = pnand %p672_p9, %p669_p8 }
  0x1b   :  { %677 = shalt.err (!%p674_p10)
}
  0x1c   :  { %s678_s1 = scalar_lea.vmem %s21_s8, 128  ;;  %p683_p12 = scmp.lt.s32.totalorder %s21_s8, %s21_s8 }
  0x1d   :  { %p679_p11 = scmp.ne.s32.totalorder %s21_s8, %s678_s1  ;;  %p684_p13 = scmp.lt.s32.totalorder %s678_s1, %s678_s1 }
  0x1f   :  { %p685_p0 = por %p684_p13, %p683_p12 }
  0x21   :  { %p686_p1 = pnand %p685_p0, %p679_p11 }
  0x23   :  { %689 = shalt.err (!%p686_p1)
}
  0x24   :  { %23 = dma.hbm_to_vmem [thread:$0]  %s893_s0, 128, %s21_s8, [#allocation3]  }
  0x25   :  { %s690_s22 = scalar_lea.hbm %s896_s3, 1024 }
  0x26   :  { %p691_p2 = scmp.ne.s32.totalorder %s896_s3, %s690_s22  ;;  %p694_p3 = scmp.lt.u32.totalorder %s690_s22, %s896_s3 }
  0x28   :  { %p696_p4 = pnand %p694_p3, %p691_p2 }
  0x2a   :  { %699 = shalt.err (!%p696_p4)
}
  0x2b   :  { %s700_s27 = scalar_lea.vmem %s44_s10, 1024  ;;  %p705_p6 = scmp.lt.s32.totalorder %s44_s10, %s44_s10 }
  0x2c   :  { %p701_p5 = scmp.ne.s32.totalorder %s44_s10, %s700_s27  ;;  %p706_p7 = scmp.lt.s32.totalorder %s700_s27, %s700_s27 }
  0x2e   :  { %p707_p8 = por %p706_p7, %p705_p6 }
  0x30   :  { %p708_p9 = pnand %p707_p8, %p701_p5 }
  0x32   :  { %711 = shalt.err (!%p708_p9)
}
  0x33   :  { %49 = dma.hbm_to_vmem [thread:$0]  %s896_s3, 1024, %s44_s10, [#allocation6], %s765_s28, %s765_s28, %s766_s29  }
  0x34   :  { %s769_s6 = smov [#allocation8]   ;;  %s712_s11 = scalar_lea.hbm %s897_s4, 1024 }
  0x35   :  { %s55_s7 = sshll.u32 %s769_s6, 4  ;;  %p713_p10 = scmp.ne.s32.totalorder %s897_s4, %s712_s11  ;;  %s56_s7 = int_to_ptr.vmem [resolvable:$true] %s55_s7 }
  0x36   :  { %p716_p11 = scmp.lt.u32.totalorder %s712_s11, %s897_s4 }
  0x38   :  { %p718_p12 = pnand %p716_p11, %p713_p10 }
  0x3a   :  { %721 = shalt.err (!%p718_p12)
}
  0x3b   :  { %s722_s16 = scalar_lea.vmem %s56_s7, 1024  ;;  %p727_p0 = scmp.lt.s32.totalorder %s56_s7, %s56_s7 }
  0x3c   :  { %p723_p13 = scmp.ne.s32.totalorder %s56_s7, %s722_s16  ;;  %p728_p1 = scmp.lt.s32.totalorder %s722_s16, %s722_s16 }
  0x3e   :  { %p729_p2 = por %p728_p1, %p727_p0 }
  0x40   :  { %p730_p3 = pnand %p729_p2, %p723_p13 }
  0x42   :  { %733 = shalt.err (!%p730_p3)
}
  0x43   :  { %61 = dma.hbm_to_vmem [thread:$0]  %s897_s4, 1024, %s56_s7, [#allocation9], %s765_s28, %s765_s28, %s766_s29  }
  0x44   :  { %756 = dma.done.wait [#allocation3], 128  }
  0x45   :  { %757 = vsyncadd [#allocation3], 4294967168 }
  0x46   :  { %758 = dma.done.wait [#allocation6], 3072  }
  0x47   :  { %759 = vsyncadd [#allocation6], 4294964224 }
  0x48   :  { %760 = dma.done.wait [#allocation9], 1024  }
  0x49   :  { %761 = vsyncadd [#allocation9], 4294966272  ;;  %v770_v0 = vmov 0.0   ;;  %v612_v1 = vld [vmem:[#allocation5 + $0x40] sm:$0xff]   ;;  %v614_v3 = vld [vmem:[#allocation5 + $0x48] sm:$0xff]   ;;  %vm771_vm0 = vmmov 0  }
  0x4a   :  { %563 = vmatprep.subr.bf16.mxu1 %v770_v0  ;;  %v613_v2 = vld [vmem:[#allocation5] sm:$0xff]   ;;  %523 = vmatprep.subr.bf16.mxu0 %v612_v1  ;;  %v615_v4 = vld [vmem:[#allocation5 + $0x8] sm:$0xff]   ;;  %v616_v5 = vld [vmem:[#allocation5 + $0x50] sm:$0xff]   ;;  %s772_s29 = smov [#allocation10]  }
  0x4b   :  { %524 = vmatpush3.bf16.msra.mxu0 %v613_v2  ;;  %v617_v6 = vld [vmem:[#allocation5 + $0x10] sm:$0xff]   ;;  %v618_v7 = vld [vmem:[#allocation5 + $0x58] sm:$0xff]   ;;  %v620_v9 = vld [vmem:[#allocation5 + $0x60] sm:$0xff]   ;;  %579 = vmatprep.mubr.msk.bf16.mxu1 %vm771_vm0, %v770_v0  ;;  %s477_s17 = sshll.u32 %s772_s29, 4  ;;  %s478_s17 = int_to_ptr.vmem [resolvable:$true] %s477_s17 }
  0x4c   :  { %525 = vmatprep.subr.bf16.mxu0 %v614_v3  ;;  %v619_v8 = vld [vmem:[#allocation5 + $0x18] sm:$0xff]   ;;  %v621_v10 = vld [vmem:[#allocation5 + $0x20] sm:$0xff]   ;;  %v622_v11 = vld [vmem:[#allocation5 + $0x68] sm:$0xff]   ;;  %p739_p5 = scmp.lt.s32.totalorder %s478_s17, %s478_s17 }
  0x4d   :  { %v75_v12 = vld [vmem:[#allocation2] sm:$0xff]  ;;  %v630_v14 = vld [vmem:[#allocation7] sm:$0xff]   ;;  %v623_v15 = vld [vmem:[#allocation5 + $0x28] sm:$0xff]  }
  0x4e   :  { %v490_v13 = vcombine.high %v75_v12, %v75_v12  ;;  %v624_v16 = vld [vmem:[#allocation5 + $0x70] sm:$0xff]   ;;  %564 = vmatpush3.bf16.msra.mxu1 %v630_v14  ;;  %v631_v17 = vld [vmem:[#allocation7 + $0x8] sm:$0xff]   ;;  %v626_v19 = vld [vmem:[#allocation5 + $0x78] sm:$0xff]   ;;  %v489_v23 = vcombine.low %v75_v12, %v75_v12 }
  0x4f   :  { %526 = vmatpush3.bf16.msra.mxu0 %v615_v4  ;;  %v625_v18 = vld [vmem:[#allocation5 + $0x30] sm:$0xff]   ;;  %565 = vmatprep.subr.bf16.mxu1 %v770_v0  ;;  %v627_v21 = vld [vmem:[#allocation5 + $0x38] sm:$0xff]   ;;  %v634_v24 = vld [vmem:[#allocation7 + $0x20] sm:$0xff]  }
  0x50   :  { %527 = vmatprep.subr.bf16.mxu0 %v616_v5  ;;  %250 = vmatprep.mubr.bf16.mxu0 %v490_v13  ;;  %v632_v20 = vld [vmem:[#allocation7 + $0x10] sm:$0xff]   ;;  %v633_v22 = vld [vmem:[#allocation7 + $0x18] sm:$0xff]   ;;  %v635_v25 = vld [vmem:[#allocation7 + $0x28] sm:$0xff]  }
  0x51   :  { %v636_v26 = vld [vmem:[#allocation7 + $0x30] sm:$0xff]   ;;  %v637_v27 = vld [vmem:[#allocation7 + $0x38] sm:$0xff]   ;;  %v638_v28 = vld [vmem:[#allocation8] sm:$0xff]  }
  0x52   :  { %566 = vmatpush3.bf16.msra.mxu1 %v631_v17  ;;  %v639_v29 = vld [vmem:[#allocation8 + $0x8] sm:$0xff]   ;;  %v640_v30 = vld [vmem:[#allocation8 + $0x10] sm:$0xff]   ;;  %v641_v31 = vld [vmem:[#allocation8 + $0x18] sm:$0xff]  }
  0x53   :  { %528 = vmatpush3.bf16.msra.mxu0 %v617_v6  ;;  %567 = vmatprep.subr.bf16.mxu1 %v770_v0  ;;  %v642_v32 = vld [vmem:[#allocation8 + $0x20] sm:$0xff]   ;;  %v643_v33 = vld [vmem:[#allocation8 + $0x28] sm:$0xff]   ;;  %v644_v34 = vld [vmem:[#allocation8 + $0x30] sm:$0xff]  }
  0x54   :  { %529 = vmatprep.subr.bf16.mxu0 %v618_v7  ;;  %v488_v36 = vld [vmem:[%s895_s2] ss:$0 sm:$0xff]  ;;  %s734_s2 = scalar_lea.vmem %s478_s17, 128 }
  0x55   :  { %v645_v44 = vld [vmem:[#allocation8 + $0x38] sm:$0xff]   ;;  %p735_p4 = scmp.ne.s32.totalorder %s478_s17, %s734_s2  ;;  %p740_p6 = scmp.lt.s32.totalorder %s734_s2, %s734_s2 }
  0x56   :  { %568 = vmatpush3.bf16.msra.mxu1 %v632_v20 }
  0x57   :  { %530 = vmatpush3.bf16.msra.mxu0 %v619_v8  ;;  %569 = vmatprep.subr.bf16.mxu1 %v770_v0  ;;  %p741_p7 = por %p740_p6, %p739_p5 }
  0x58   :  { %531 = vmatprep.subr.bf16.mxu0 %v620_v9 }
  0x59   :  { %p742_p8 = pnand %p741_p7, %p735_p4 }
  0x5a   :  { %570 = vmatpush3.bf16.msra.mxu1 %v633_v22 }
  0x5b   :  { %532 = vmatpush3.bf16.msra.mxu0 %v621_v10  ;;  %571 = vmatprep.subr.bf16.mxu1 %v770_v0 }
  0x5c   :  { %533 = vmatprep.subr.bf16.mxu0 %v622_v11 }
  0x5e   :  { %572 = vmatpush3.bf16.msra.mxu1 %v634_v24 }
  0x5f   :  { %534 = vmatpush3.bf16.msra.mxu0 %v623_v15  ;;  %573 = vmatprep.subr.bf16.mxu1 %v770_v0 }
  0x60   :  { %535 = vmatprep.subr.bf16.mxu0 %v624_v16 }
  0x62   :  { %574 = vmatpush3.bf16.msra.mxu1 %v635_v25 }
  0x63   :  { %536 = vmatpush3.bf16.msra.mxu0 %v625_v18  ;;  %575 = vmatprep.subr.bf16.mxu1 %v770_v0 }
  0x64   :  { %537 = vmatprep.subr.bf16.mxu0 %v626_v19 }
  0x66   :  { %576 = vmatpush3.bf16.msra.mxu1 %v636_v26 }
  0x67   :  { %538 = vmatpush3.bf16.msra.mxu0 %v627_v21  ;;  %577 = vmatprep.subr.bf16.mxu1 %v770_v0 }
  0x68   :  { %583 = vmatprep.subr.bf16.mxu0 %v770_v0 }
  0x6a   :  { %251 = vmatmul.mubr.bf16.vlgmr.msra.gmra.mrb[0].mxu0 %v489_v23  ;;  %578 = vmatpush3.bf16.msra.mxu1 %v637_v27 }
  0x6b   :  { %599 = vmatprep.mubr.msk.bf16.mxu0 %vm771_vm0, %v770_v0  ;;  %584 = vmatpush3.bf16.msra.mxu0 %v638_v28 }
  0x6c   :  { %585 = vmatprep.subr.bf16.mxu0 %v770_v0 }
  0x6f   :  { %586 = vmatpush3.bf16.msra.mxu0 %v639_v29 }
  0x70   :  { %587 = vmatprep.subr.bf16.mxu0 %v770_v0 }
  0x73   :  { %588 = vmatpush3.bf16.msra.mxu0 %v640_v30 }
  0x74   :  { %589 = vmatprep.subr.bf16.mxu0 %v770_v0 }
  0x77   :  { %590 = vmatpush3.bf16.msra.mxu0 %v641_v31 }
  0x78   :  { %591 = vmatprep.subr.bf16.mxu0 %v770_v0 }
  0x7b   :  { %592 = vmatpush3.bf16.msra.mxu0 %v642_v32 }
  0x7c   :  { %593 = vmatprep.subr.bf16.mxu0 %v770_v0 }
  0x7f   :  { %594 = vmatpush3.bf16.msra.mxu0 %v643_v33 }
  0x80   :  { %595 = vmatprep.subr.bf16.mxu0 %v770_v0 }
  0x83   :  { %596 = vmatpush3.bf16.msra.mxu0 %v644_v34 }
  0x84   :  { %597 = vmatprep.subr.bf16.mxu0 %v770_v0 }
  0x87   :  { %598 = vmatpush3.bf16.msra.mxu0 %v645_v44 }
 0x13d   :  { %v539_v35 = vpop.f32.mrb[0].mxu0 }
 0x13e   :  { %v540_v37 = vpop.f32.mrb[1].mxu0 }
 0x13f   :  { %v541_v38 = vadd.f32 %v540_v37, %v539_v35  ;;  %v542_v39 = vpop.f32.mrb[2].mxu0 }
 0x140   :  { %v543_v40 = vpop.f32.mrb[3].mxu0 }
 0x141   :  { %v253_v41 = vadd.f32 %v541_v38, %v488_v36 }
 0x143   :  { %v258_v42 = vmax.f32 %v253_v41, 0.0 }
 0x145   :  { %v259_v43 = vpack.c.bf16 %v258_v42, %v258_v42 }
 0x147   :  { %580 = vmatmul.mubr.bf16.vlgmr.msra.gmra.mrb[0].mxu1 %v259_v43 }
 0x21a   :  { %v358_v45 = vpop.f32.mrb[0].mxu1 }
 0x21b   :  { %v364_v46 = vmax.f32 %v358_v45, 0.0  ;;  %v581_v47 = vpop.f32.mrb[1].mxu1 }
 0x21c   :  { %v361_v48 = vpop.f32.mrb[2].mxu1 }
 0x21d   :  { %v365_v49 = vpack.c.bf16 %v364_v46, %v364_v46  ;;  %v582_v50 = vpop.f32.mrb[3].mxu1 }
 0x21f   :  { %600 = vmatmul.mubr.bf16.vlgmr.msra.gmra.mrb[4].mxu0 %v365_v49 }
 0x2f2   :  { %v464_v51 = vpop.f32.mrb[4].mxu0 }
 0x2f3   :  { %470 = vst [vmem:[#allocation10] sm:$0xff] %v464_v51  ;;  %v601_v52 = vpop.f32.mrb[5].mxu0 }
 0x2f4   :  { %v467_v53 = vpop.f32.mrb[6].mxu0 }
 0x2f5   :  { %745 = shalt.err (!%p742_p8)
}
 0x2f6   :  { %s746_s19 = scalar_lea.hbm %s898_s5, 128 }
 0x2f7   :  { %p747_p9 = scmp.ne.s32.totalorder %s898_s5, %s746_s19  ;;  %p750_p10 = scmp.lt.u32.totalorder %s746_s19, %s898_s5 }
 0x2f9   :  { %p752_p11 = pnand %p750_p10, %p747_p9 }
 0x2fb   :  { %755 = shalt.err (!%p752_p11)
}
 0x2fc   :  { %480 = dma.vmem_to_hbm [thread:$0]  %s478_s17, 128, %s898_s5, [#allocation4]   ;;  %v602_v54 = vpop.f32.mrb[7].mxu0 }
 0x2fd   :  { %762 = dma.done.wait [#allocation4], 128  }
 0x2fe   :  { %763 = vsyncadd [#allocation4], 4294967168 }
 0x2ff   :  { %484 = vsyncpa [#allocation3], 1 }
 0x300   :  { %485 = vsyncpa [#allocation6], 1 }
 0x301   :  { %486 = vsyncpa [#allocation9], 1 }
 0x302   :  { %487 = vsyncpa [#allocation4], 1 }

</bundles_post_ra>
